<compile_context>
chip_gen: v6e
topology: v6e:2x2x1
jax: 0.10.0
libtpu: 0.0.40
codegen_flags: <defaults>
</compile_context>

<pallas_src>
import jax
import jax.numpy as jnp
from jax.experimental import pallas as pl
from jax.experimental.pallas import tpu as pltpu


def match_kernel(feat_ref, score_ref, lbias_ref, wslab_ref, bslab_ref, out_ref):
    F = feat_ref.shape[0]
    H = lbias_ref.shape[0]

    # Packed bf16 weight slab: [ w1 (H,H) | w2' (H,H) | wf (H,F) ]
    w1 = wslab_ref[:, 0:H]
    w2 = wslab_ref[:, H:2 * H]
    wf = wslab_ref[:, 2 * H:2 * H + F]

    # Packed f32 constants: [ b1 | b2' | w3'^T | b3' (row 0 only) ]
    b1 = bslab_ref[:, 0:1]          # (H, 1)
    b2 = bslab_ref[:, 1:2]          # (H, 1)
    w3 = bslab_ref[:, 2:3]          # (H, 1)
    b3 = bslab_ref[0:1, 3:4]        # (1, 1)

    # fuse: Conv1d(F+L -> H, k=1) + ReLU.  The language half of the concat and
    # the fuse bias are pre-folded into lbias (H, N), lane-dense.
    h = jnp.dot(wf, feat_ref[...], preferred_element_type=jnp.float32) + lbias_ref[...]
    h = jnp.maximum(h, 0.0)                                           # (H, N) f32

    # NOTE: the original `ref_features * objectness_masks` is intentionally
    # skipped: all subsequent ops are per-column, and masked columns are
    # overwritten with -1e30 below.

    # match[0:3]: Conv1d(H->H,1) + ReLU (BN1 folded into w2/b2)
    h1 = jnp.maximum(
        jnp.dot(w1, h.astype(jnp.bfloat16),
                preferred_element_type=jnp.float32) + b1, 0.0)
    # match[3:6]: Conv1d(H->H,1) + ReLU (BN2 folded into w3/b3)
    h2 = jnp.maximum(
        jnp.dot(w2, h1.astype(jnp.bfloat16),
                preferred_element_type=jnp.float32) + b2, 0.0)
    # match[6]: Conv1d(H->1,1) as VPU multiply + sublane reduce (no M=1 matmul)
    conf = jnp.sum(h2 * w3, axis=0, keepdims=True) + b3               # (1, N)

    # masked_fill_(mask == 0, -1e30)
    out_ref[...] = jnp.where(score_ref[...] > 0.0, conf, jnp.float32(-1e30))


def fold_params(params, num_features):
    """One-time (not per-call) parameter folding / packing. Plain JAX."""
    F = num_features
    w_fuse = params["w_fuse"].astype(jnp.float32)       # (H, F+L)
    H = w_fuse.shape[0]
    wf_f = w_fuse[:, :F]                                 # (H, F)
    wf_l = w_fuse[:, F:]                                 # (H, L)

    eps = 1e-5
    s1 = params["bn1_gamma"] / jnp.sqrt(params["bn1_var"] + eps)
    t1 = params["bn1_beta"] - params["bn1_mean"] * s1
    s2 = params["bn2_gamma"] / jnp.sqrt(params["bn2_var"] + eps)
    t2 = params["bn2_beta"] - params["bn2_mean"] * s2

    w1 = params["w1"].astype(jnp.float32)
    w2 = params["w2"].astype(jnp.float32)
    w3 = params["w3"].astype(jnp.float32)                # (1, H)
    # fold BN1 into conv2, BN2 into conv3 (W' = W * s_row, b' = W @ t + b)
    w2p = w2 * s1[None, :]
    b2p = w2 @ t1 + params["b2"]
    w3p = w3 * s2[None, :]                               # (1, H)
    b3p = w3 @ t2 + params["b3"]                         # (1,)

    wslab = jnp.concatenate([w1, w2p, wf_f], axis=1).astype(jnp.bfloat16)  # (H, 2H+F)
    b3col = jnp.zeros((H,), jnp.float32).at[0].set(b3p[0])
    bslab = jnp.stack([params["b1"].astype(jnp.float32), b2p, w3p[0], b3col],
                      axis=1)                                               # (H, 4)
    return {
        "wslab": wslab,
        "bslab": bslab,
        "wf_l": wf_l.astype(jnp.float32),
        "b_fuse": params["b_fuse"].astype(jnp.float32),
    }


@jax.jit
def match_module_forward(last_features, objectness_scores, lang_emb, folded):
    """Returns data_dict['cluster_ref'] of shape (B, num_proposals)."""
    B, F, P = last_features.shape            # last_features is NCW: (B, F, P)
    H = folded["wslab"].shape[0]
    N = B * P                                 # batch folded into lane axis
    # NOTE: assumes P is a multiple of 128 (true for this module's configs);
    # pad P in the caller otherwise to keep lane-dense stores.

    feats = jnp.transpose(last_features, (1, 0, 2)).reshape(F, N).astype(jnp.bfloat16)
    scores = objectness_scores.astype(jnp.float32).reshape(1, N)           # (1, N)

    # per-batch language bias: wf_l @ lang + b_fuse, broadcast lane-dense (H, N)
    lb = lang_emb.astype(jnp.float32) @ folded["wf_l"].T + folded["b_fuse"]  # (B, H)
    lbias = jnp.broadcast_to(lb.T[:, :, None], (H, B, P)).reshape(H, N)

    conf = pl.pallas_call(
        match_kernel,
        out_shape=jax.ShapeDtypeStruct((1, N), jnp.float32),
        grid=(1,),
        in_specs=[
            pl.BlockSpec((F, N), lambda i: (0, 0)),                  # features
            pl.BlockSpec((1, N), lambda i: (0, 0)),                  # scores
            pl.BlockSpec((H, N), lambda i: (0, 0)),                  # lang bias
            pl.BlockSpec(folded["wslab"].shape, lambda i: (0, 0)),   # packed weights
            pl.BlockSpec(folded["bslab"].shape, lambda i: (0, 0)),   # packed consts
        ],
        out_specs=pl.BlockSpec((1, N), lambda i: (0, 0)),
        compiler_params=pltpu.CompilerParams(
            dimension_semantics=("arbitrary",)),
    )(feats, scores, lbias, folded["wslab"], folded["bslab"])

    return conf.reshape(B, P)   # free bitcast reshape; lane n = b*P + p


def reference_forward(last_features, objectness_scores, lang_emb, params):
    """Pure-JAX f32 reference matching the PyTorch forward (eval-mode BN)."""
    feats = jnp.transpose(last_features, (0, 2, 1))
    B, P, F = feats.shape
    L = lang_emb.shape[-1]
    lang = jnp.broadcast_to(lang_emb[:, None, :], (B, P, L))
    x = jnp.concatenate([feats, lang], axis=-1)
    h = jax.nn.relu(x @ params["w_fuse"].T + params["b_fuse"])
    mask = (objectness_scores > 0).astype(jnp.float32)      # (B, P, 1)
    h = h * mask
    eps = 1e-5

    def bn(v, g, b, m, var):
        return (v - m) / jnp.sqrt(var + eps) * g + b

    h1 = bn(jax.nn.relu(h @ params["w1"].T + params["b1"]),
            params["bn1_gamma"], params["bn1_beta"], params["bn1_mean"], params["bn1_var"])
    h2 = bn(jax.nn.relu(h1 @ params["w2"].T + params["b2"]),
            params["bn2_gamma"], params["bn2_beta"], params["bn2_mean"], params["bn2_var"])
    conf = (h2 @ params["w3"].T + params["b3"])[..., 0]
    conf = jnp.where(mask[..., 0] == 0, jnp.float32(-1e30), conf)
    return conf


if __name__ == "__main__":
    # small shapes consistent with the module: num_proposals=128, num_features=96,
    # lang_size=32, hidden_size=64, batch=2
    B, P, F, L, H = 2, 128, 96, 32, 64

    key = jax.random.PRNGKey(0)
    ks = jax.random.split(key, 20)

    last_features = jax.random.normal(ks[0], (B, F, P), jnp.float32)       # NCW like PyTorch
    objectness_scores = jax.random.normal(ks[1], (B, P, 1), jnp.float32)
    lang_emb = jax.random.normal(ks[2], (B, L), jnp.float32)

    params = {
        "w_fuse": 0.05 * jax.random.normal(ks[3], (H, F + L), jnp.float32),
        "b_fuse": 0.05 * jax.random.normal(ks[4], (H,), jnp.float32),
        "w1": 0.05 * jax.random.normal(ks[5], (H, H), jnp.float32),
        "b1": 0.05 * jax.random.normal(ks[6], (H,), jnp.float32),
        "w2": 0.05 * jax.random.normal(ks[7], (H, H), jnp.float32),
        "b2": 0.05 * jax.random.normal(ks[8], (H,), jnp.float32),
        "w3": 0.05 * jax.random.normal(ks[9], (1, H), jnp.float32),
        "b3": 0.05 * jax.random.normal(ks[10], (1,), jnp.float32),
        "bn1_gamma": 1.0 + 0.1 * jax.random.normal(ks[11], (H,), jnp.float32),
        "bn1_beta": 0.1 * jax.random.normal(ks[12], (H,), jnp.float32),
        "bn1_mean": 0.1 * jax.random.normal(ks[13], (H,), jnp.float32),
        "bn1_var": 0.5 + jnp.abs(0.5 * jax.random.normal(ks[14], (H,), jnp.float32)),
        "bn2_gamma": 1.0 + 0.1 * jax.random.normal(ks[15], (H,), jnp.float32),
        "bn2_beta": 0.1 * jax.random.normal(ks[16], (H,), jnp.float32),
        "bn2_mean": 0.1 * jax.random.normal(ks[17], (H,), jnp.float32),
        "bn2_var": 0.5 + jnp.abs(0.5 * jax.random.normal(ks[18], (H,), jnp.float32)),
    }

    # one-time parameter folding / packing (outside the per-forward path)
    folded = jax.tree_util.tree_map(jax.block_until_ready, fold_params(params, F))

    cluster_ref = match_module_forward(last_features, objectness_scores, lang_emb, folded)
    cluster_ref = jax.block_until_ready(cluster_ref)

    expected = reference_forward(last_features, objectness_scores, lang_emb, params)
    assert cluster_ref.shape == (B, P)
    # bf16 matmul operands (f32 accumulation) -> loosen tolerance vs f32 reference
    assert jnp.allclose(cluster_ref, expected, rtol=5e-2, atol=5e-2), "mismatch vs reference"

    print("KERNEL_OK")
</pallas_src>

<mosaic_0001>
module attributes {stable_mosaic.version = 11 : i64} {
  func.func @match_kernel(%arg0: i32, %arg1: memref<96x256xbf16, #tpu.memory_space<vmem>>, %arg2: memref<1x256xf32, #tpu.memory_space<vmem>>, %arg3: memref<64x256xf32, #tpu.memory_space<vmem>>, %arg4: memref<64x224xbf16, #tpu.memory_space<vmem>>, %arg5: memref<64x4xf32, #tpu.memory_space<vmem>>, %arg6: memref<1x256xf32, #tpu.memory_space<vmem>>) attributes {dimension_semantics = [#tpu.dimension_semantics<arbitrary>], iteration_bounds = array<i64: 1>, scalar_prefetch = 0 : i64, scratch_operands = 0 : i64, tpu.core_type = #tpu.core_type<tc>, window_params = [{pipeline_mode = #tpu.pipeline_mode<synchronous>, transform_indices = @transform_0, window_bounds = array<i64: 96, 256>}, {pipeline_mode = #tpu.pipeline_mode<synchronous>, transform_indices = @transform_1, window_bounds = array<i64: 1, 256>}, {pipeline_mode = #tpu.pipeline_mode<synchronous>, transform_indices = @transform_2, window_bounds = array<i64: 64, 256>}, {pipeline_mode = #tpu.pipeline_mode<synchronous>, transform_indices = @transform_3, window_bounds = array<i64: 64, 224>}, {pipeline_mode = #tpu.pipeline_mode<synchronous>, transform_indices = @transform_4, window_bounds = array<i64: 64, 4>}, {pipeline_mode = #tpu.pipeline_mode<synchronous>, transform_indices = @transform_5, window_bounds = array<i64: 1, 256>}]} {
    %c0 = arith.constant 0 : index
    %c0_0 = arith.constant 0 : index
    %0 = vector.load %arg4[%c0, %c0_0] : memref<64x224xbf16, #tpu.memory_space<vmem>>, vector<64x64xbf16>
    %c0_1 = arith.constant 0 : index
    %c64 = arith.constant 64 : index
    %1 = vector.load %arg4[%c0_1, %c64] : memref<64x224xbf16, #tpu.memory_space<vmem>>, vector<64x64xbf16>
    %c0_2 = arith.constant 0 : index
    %c128 = arith.constant 128 : index
    %2 = vector.load %arg4[%c0_2, %c128] : memref<64x224xbf16, #tpu.memory_space<vmem>>, vector<64x96xbf16>
    %c0_3 = arith.constant 0 : index
    %c0_4 = arith.constant 0 : index
    %3 = vector.load %arg5[%c0_3, %c0_4] : memref<64x4xf32, #tpu.memory_space<vmem>>, vector<64x1xf32>
    %c0_5 = arith.constant 0 : index
    %c1 = arith.constant 1 : index
    %4 = vector.load %arg5[%c0_5, %c1] : memref<64x4xf32, #tpu.memory_space<vmem>>, vector<64x1xf32>
    %c0_6 = arith.constant 0 : index
    %c2 = arith.constant 2 : index
    %5 = vector.load %arg5[%c0_6, %c2] : memref<64x4xf32, #tpu.memory_space<vmem>>, vector<64x1xf32>
    %c0_7 = arith.constant 0 : index
    %c3 = arith.constant 3 : index
    %6 = vector.load %arg5[%c0_7, %c3] : memref<64x4xf32, #tpu.memory_space<vmem>>, vector<1x1xf32>
    %c0_8 = arith.constant 0 : index
    %c0_9 = arith.constant 0 : index
    %7 = vector.load %arg1[%c0_8, %c0_9] : memref<96x256xbf16, #tpu.memory_space<vmem>>, vector<96x256xbf16>
    %cst = arith.constant dense<0.000000e+00> : vector<64x256xf32>
    %8 = tpu.matmul %2, %7, %cst {dimension_numbers = #tpu.dot_dimension_numbers<[1], [0], [0], [1], [0, 0, 1, 1], [], []>} : vector<64x96xbf16>, vector<96x256xbf16>, vector<64x256xf32> -> vector<64x256xf32>
    %c0_10 = arith.constant 0 : index
    %c0_11 = arith.constant 0 : index
    %9 = vector.load %arg3[%c0_10, %c0_11] : memref<64x256xf32, #tpu.memory_space<vmem>>, vector<64x256xf32>
    %10 = arith.addf %8, %9 : vector<64x256xf32>
    %cst_12 = arith.constant 0.000000e+00 : f32
    %11 = vector.broadcast %cst_12 : f32 to vector<64x256xf32>
    %12 = arith.maximumf %10, %11 : vector<64x256xf32>
    %13 = arith.truncf %12 : vector<64x256xf32> to vector<64x256xbf16>
    %cst_13 = arith.constant dense<0.000000e+00> : vector<64x256xf32>
    %14 = tpu.matmul %0, %13, %cst_13 {dimension_numbers = #tpu.dot_dimension_numbers<[1], [0], [0], [1], [0, 0, 1, 1], [], []>} : vector<64x64xbf16>, vector<64x256xbf16>, vector<64x256xf32> -> vector<64x256xf32>
    %15 = vector.broadcast %3 : vector<64x1xf32> to vector<64x256xf32>
    %16 = arith.addf %14, %15 : vector<64x256xf32>
    %cst_14 = arith.constant 0.000000e+00 : f32
    %17 = vector.broadcast %cst_14 : f32 to vector<64x256xf32>
    %18 = arith.maximumf %16, %17 : vector<64x256xf32>
    %19 = arith.truncf %18 : vector<64x256xf32> to vector<64x256xbf16>
    %cst_15 = arith.constant dense<0.000000e+00> : vector<64x256xf32>
    %20 = tpu.matmul %1, %19, %cst_15 {dimension_numbers = #tpu.dot_dimension_numbers<[1], [0], [0], [1], [0, 0, 1, 1], [], []>} : vector<64x64xbf16>, vector<64x256xbf16>, vector<64x256xf32> -> vector<64x256xf32>
    %21 = vector.broadcast %4 : vector<64x1xf32> to vector<64x256xf32>
    %22 = arith.addf %20, %21 : vector<64x256xf32>
    %cst_16 = arith.constant 0.000000e+00 : f32
    %23 = vector.broadcast %cst_16 : f32 to vector<64x256xf32>
    %24 = arith.maximumf %22, %23 : vector<64x256xf32>
    %25 = vector.broadcast %5 : vector<64x1xf32> to vector<64x256xf32>
    %26 = arith.mulf %24, %25 : vector<64x256xf32>
    %cst_17 = arith.constant dense<0.000000e+00> : vector<256xf32>
    %27 = vector.multi_reduction <add>, %26, %cst_17 [0] : vector<64x256xf32> to vector<256xf32>
    %28 = vector.shape_cast %27 : vector<256xf32> to vector<1x256xf32>
    %29 = vector.broadcast %6 : vector<1x1xf32> to vector<1x256xf32>
    %30 = arith.addf %28, %29 : vector<1x256xf32>
    %c0_18 = arith.constant 0 : index
    %c0_19 = arith.constant 0 : index
    %31 = vector.load %arg2[%c0_18, %c0_19] : memref<1x256xf32, #tpu.memory_space<vmem>>, vector<1x256xf32>
    %cst_20 = arith.constant 0.000000e+00 : f32
    %32 = vector.broadcast %cst_20 : f32 to vector<1x256xf32>
    %33 = arith.cmpf ogt, %31, %32 : vector<1x256xf32>
    %cst_21 = arith.constant -1.000000e+30 : f32
    %34 = vector.broadcast %cst_21 : f32 to vector<1x256xf32>
    %35 = arith.select %33, %30, %34 : vector<1x256xi1>, vector<1x256xf32>
    %c0_22 = arith.constant 0 : index
    %c0_23 = arith.constant 0 : index
    %36 = vector.load %arg6[%c0_22, %c0_23] : memref<1x256xf32, #tpu.memory_space<vmem>>, vector<1x256xf32>
    tpu.vector_store %arg6[%c0_22, %c0_23], %35 {strides = array<i32>} : memref<1x256xf32, #tpu.memory_space<vmem>>, vector<1x256xf32>,
    return
  }
  func.func @transform_0(%arg0: i32) -> (i32, i32) {
    %c0_i32 = arith.constant 0 : i32
    %c0_i32_0 = arith.constant 0 : i32
    %c0_i32_1 = arith.constant 0 : i32
    return %c0_i32, %c0_i32_0 : i32, i32
  }
  func.func @transform_1(%arg0: i32) -> (i32, i32) {
    %c0_i32 = arith.constant 0 : i32
    %c0_i32_0 = arith.constant 0 : i32
    %c0_i32_1 = arith.constant 0 : i32
    return %c0_i32, %c0_i32_0 : i32, i32
  }
  func.func @transform_2(%arg0: i32) -> (i32, i32) {
    %c0_i32 = arith.constant 0 : i32
    %c0_i32_0 = arith.constant 0 : i32
    %c0_i32_1 = arith.constant 0 : i32
    return %c0_i32, %c0_i32_0 : i32, i32
  }
  func.func @transform_3(%arg0: i32) -> (i32, i32) {
    %c0_i32 = arith.constant 0 : i32
    %c0_i32_0 = arith.constant 0 : i32
    %c0_i32_1 = arith.constant 0 : i32
    return %c0_i32, %c0_i32_0 : i32, i32
  }
  func.func @transform_4(%arg0: i32) -> (i32, i32) {
    %c0_i32 = arith.constant 0 : i32
    %c0_i32_0 = arith.constant 0 : i32
    %c0_i32_1 = arith.constant 0 : i32
    return %c0_i32, %c0_i32_0 : i32, i32
  }
  func.func @transform_5(%arg0: i32) -> (i32, i32) {
    %c0_i32 = arith.constant 0 : i32
    %c0_i32_0 = arith.constant 0 : i32
    %c0_i32_1 = arith.constant 0 : i32
    return %c0_i32, %c0_i32_0 : i32, i32
  }
}

</mosaic_0001>

<bundles_post_ra>
// kernel: match_module_forward.1
= control target key start
LH: loop header
LB: loop body
LE: loop exit
PB: predicated region body
PF: predicated region fallthrough
CT: control target
= control target key end

     0   :  { %v804_v2 = vmov 0   ;;  %s1066_s0 = inlined_call_operand.vmem [shape: bf16[96,256], index: 0, kind: input, shape index: {}]   ;;  %s1067_s1 = inlined_call_operand.vmem [shape: f32[1,256], index: 1, kind: input, shape index: {}]   ;;  %s1068_s2 = inlined_call_operand.vmem [shape: f32[64,256], index: 2, kind: input, shape index: {}]   ;;  %s1069_s3 = inlined_call_operand.vmem [shape: bf16[64,224], index: 3, kind: input, shape index: {}]   ;;  %s1070_s4 = inlined_call_operand.vmem [shape: f32[64,4], index: 4, kind: input, shape index: {}]   ;;  %s1071_s5 = inlined_call_operand.hbm [shape: f32[1,256], index: 5, kind: output, shape index: {}]  }
   0x1   :  { %v756_v0 = vld [vmem:[%s1066_s0 + $0x54] ss:$8 sps:$4 sm:$0xff]   ;;  %v758_v1 = vld [vmem:[%s1066_s0 + $0x50] ss:$8 sps:$4 sm:$0xff]   ;;  %200 = vmatprep.mubr.bf16.mxu0 %v804_v2  ;;  %390 = vmatprep.mubr.bf16.mxu1 %v804_v2  ;;  %v759_v3 = vld [vmem:[%s1066_s0 + $0x44] ss:$8 sps:$4 sm:$0xff]  }
   0x2   :  { %172 = vmatprep.subr.bf16.mxu0 %v756_v0  ;;  %745 = vset.pattern.permute.xlu1 %v804_v2  ;;  %v761_v4 = vld [vmem:[%s1066_s0 + $0x40] ss:$8 sps:$4 sm:$0xff]   ;;  %v762_v5 = vld [vmem:[%s1066_s0 + $0x34] ss:$8 sps:$4 sm:$0xff]   ;;  %v764_v6 = vld [vmem:[%s1066_s0 + $0x30] ss:$8 sps:$4 sm:$0xff]  }
   0x3   :  { %173 = vmatpush1.bf16.msra.mxu0 %v758_v1  ;;  %744 = vset.pattern.permute.xlu0 %v804_v2  ;;  %v765_v7 = vld [vmem:[%s1066_s0 + $0x24] ss:$8 sps:$4 sm:$0xff]   ;;  %v767_v8 = vld [vmem:[%s1066_s0 + $0x20] ss:$8 sps:$4 sm:$0xff]   ;;  %v768_v9 = vld [vmem:[%s1066_s0 + $0x14] ss:$8 sps:$4 sm:$0xff]  }
   0x4   :  { %174 = vmatprep.subr.bf16.mxu0 %v759_v3  ;;  %v770_v10 = vld [vmem:[%s1066_s0 + $0x10] ss:$8 sps:$4 sm:$0xff]  }
   0x7   :  { %175 = vmatpush1.bf16.msra.mxu0 %v761_v4 }
   0x8   :  { %176 = vmatprep.subr.bf16.mxu0 %v762_v5 }
   0xb   :  { %177 = vmatpush1.bf16.msra.mxu0 %v764_v6 }
   0xc   :  { %178 = vmatprep.subr.bf16.mxu0 %v765_v7 }
   0xf   :  { %179 = vmatpush1.bf16.msra.mxu0 %v767_v8 }
  0x10   :  { %10 = vsyncpa [#allocation3], 0  ;;  %180 = vmatprep.subr.bf16.mxu0 %v768_v9  ;;  %v771_v11 = vld [vmem:[%s1066_s0 + $0x4] ss:$8 sps:$4 sm:$0xff]   ;;  %v773_v12 = vld [vmem:[%s1066_s0] ss:$8 sps:$4 sm:$0xff]  }
  0x11   :  { %v774_v13 = vld [vmem:[%s1069_s3 + $0x4] ss:$8 sps:$4 sm:$0xff]   ;;  %vm155_vm0 = vcmask 785408   ;;  %v775_v14 = vld [vmem:[%s1069_s3 + $0x14] ss:$8 sps:$4 sm:$0xff]   ;;  %s805_s19 = smov 64  }
  0x12   :  { %v776_v15 = vld [vmem:[%s1069_s3 + $0x24] ss:$8 sps:$4 sm:$0xff]   ;;  %v777_v16 = vld [vmem:[%s1069_s3 + $0x34] ss:$8 sps:$4 sm:$0xff]   ;;  %v948_v25 = vld [vmem:[%s1069_s3] ss:$8 sps:$4 sm:$0xff]  }
  0x13   :  { %181 = vmatpush1.bf16.msra.mxu0 %v770_v10  ;;  %v900_v17 = vld [vmem:[%s1070_s4 + $0x30] sm:$0xff]  ;;  %v905_v18 = vld [vmem:[%s1070_s4 + $0x20] sm:$0xff]  ;;  %v912_v19 = vld [vmem:[%s1070_s4 + $0x38] sm:$0xff]  ;;  %vm325_vm1 = vcmask 523264   ;;  %s810_s29 = smov [#allocation2]  }
  0x14   :  { %182 = vmatprep.subr.bf16.mxu0 %v771_v11  ;;  %297 = vperm.xlu0 %744, %v900_v17   ;;  %v917_v20 = vld [vmem:[%s1070_s4 + $0x28] sm:$0xff]  ;;  %v924_v21 = vld [vmem:[%s1070_s4 + $0x18] sm:$0xff]  ;;  %v929_v22 = vld [vmem:[%s1070_s4 + $0x10] sm:$0xff]  ;;  %s689_s30 = sshll.u32 %s810_s29, 4  ;;  %s690_s30 = int_to_ptr.vmem [resolvable:$true] %s689_s30 }
  0x15   :  { %287 = vperm.xlu1 %745, %v905_v18   ;;  %v936_v23 = vld [vmem:[%s1070_s4 + $0x8] sm:$0xff]  ;;  %v941_v24 = vld [vmem:[%s1070_s4] sm:$0xff]  ;;  %v953_v26 = vld [vmem:[%s1069_s3 + $0x10] ss:$8 sps:$4 sm:$0xff]   ;;  %s782_s6 = scalar_lea.vmem %s690_s30, 32  ;;  %p787_p1 = scmp.lt.s32.totalorder %s690_s30, %s690_s30 }
  0x16   :  { %v960_v27 = vld [vmem:[%s1069_s3 + $0x20] ss:$8 sps:$4 sm:$0xff]   ;;  %v965_v28 = vld [vmem:[%s1069_s3 + $0x30] ss:$8 sps:$4 sm:$0xff]   ;;  %p783_p0 = scmp.ne.s32.totalorder %s690_s30, %s782_s6  ;;  %p788_p2 = scmp.lt.s32.totalorder %s782_s6, %s782_s6 }
  0x17   :  { %183 = vmatpush1.bf16.msra.mxu0 %v773_v12  ;;  %v70_v42 = vld [vmem:[%s1068_s2 + $0x58] sm:$0xff]  ;;  %v72_v43 = vld [vmem:[%s1068_s2 + $0x68] sm:$0xff]  ;;  %v73_v45 = vld [vmem:[%s1068_s2 + $0x70] sm:$0xff] }
  0x18   :  { %302 = vperm.xlu0 %744, %v912_v19   ;;  %v71_v46 = vld [vmem:[%s1068_s2 + $0x60] sm:$0xff]  ;;  %v68_v47 = vld [vmem:[%s1068_s2 + $0x48] sm:$0xff]  ;;  %v74_v49 = vld [vmem:[%s1068_s2 + $0x78] sm:$0xff]  ;;  %p789_p3 = por %p788_p2, %p787_p1 }
  0x19   :  { %292 = vperm.xlu1 %745, %v917_v20   ;;  %v69_v50 = vld [vmem:[%s1068_s2 + $0x50] sm:$0xff]  ;;  %v66_v54 = vld [vmem:[%s1068_s2 + $0x38] sm:$0xff]  ;;  %v67_v57 = vld [vmem:[%s1068_s2 + $0x40] sm:$0xff] }
  0x1a   :  { %713 = vmatmul.mubr.msk.bf16.vlgmr.msra.gmra.mxu0 %vm155_vm0, %v774_v13  ;;  %v64_v60 = vld [vmem:[%s1068_s2 + $0x28] sm:$0xff]  ;;  %v65_v63 = vld [vmem:[%s1068_s2 + $0x30] sm:$0xff]  ;;  %v62_v5 = vld [vmem:[%s1068_s2 + $0x18] sm:$0xff]  ;;  %p790_p4 = pnand %p789_p3, %p783_p0 }
  0x1b   :  { %210 = vmatprep.mubr.bf16.mxu0 %v804_v2  ;;  %v63_v8 = vld [vmem:[%s1068_s2 + $0x20] sm:$0xff]  ;;  %v60_v12 = vld [vmem:[%s1068_s2 + $0x8] sm:$0xff] }
  0x1c   :  { %277 = vperm.xlu0 %744, %v929_v22  }
  0x1d   :  { %282 = vperm.xlu1 %745, %v924_v21  }
  0x20   :  { %267 = vperm.xlu0 %744, %v941_v24  }
  0x21   :  { %272 = vperm.xlu1 %745, %v936_v23  }
  0x22   :  { %714 = vmatmul.mubr.msk.bf16.gmra.mxu0 %vm155_vm0, %v775_v14 }
  0x23   :  { %220 = vmatprep.mubr.bf16.mxu0 %v804_v2 }
  0x24   :  { %467 = vrot.lane.b32.xlu0 %v948_v25, %s805_s19 }
  0x25   :  { %469 = vrot.lane.b32.xlu1 %v953_v26, %s805_s19 }
  0x28   :  { %471 = vrot.lane.b32.xlu0 %v960_v27, %s805_s19 }
  0x29   :  { %473 = vrot.lane.b32.xlu1 %v965_v28, %s805_s19 }
  0x2a   :  { %715 = vmatmul.mubr.msk.bf16.gmra.mxu0 %vm155_vm0, %v776_v15 }
  0x2b   :  { %230 = vmatprep.mubr.bf16.mxu0 %v804_v2 }
  0x32   :  { %716 = vmatmul.mubr.msk.bf16.gmra.mxu0 %vm155_vm0, %v777_v16  ;;  %v61_v16 = vld [vmem:[%s1068_s2 + $0x10] sm:$0xff] }
  0x33   :  { %370 = vmatprep.mubr.bf16.mxu0 %v804_v2 }
  0xda   :  { %v969_v29 = vpop.f32.mrf.mxu0 }
  0xdc   :  { %v204_v30 = vpop.f32.mrf.mxu0 }
  0xde   :  { %v971_v31 = vpop.f32.mrf.mxu0 }
  0xe0   :  { %v208_v32 = vpop.f32.mrf.mxu0 }
  0xe2   :  { %v212_v33 = vpop.f32.mrf.mxu0 }
  0xe4   :  { %v214_v34 = vpop.f32.mrf.mxu0 }
  0xe5   :  { %v215_v9 = vadd.f32 %v214_v34, %v64_v60 }
  0xe6   :  { %v216_v35 = vpop.f32.mrf.mxu0 }
  0xe7   :  { %v217_v13 = vadd.f32 %v216_v35, %v65_v63  ;;  %v205_v35 = vadd.f32 %v204_v30, %v60_v12 }
  0xe8   :  { %v218_v36 = vpop.f32.mrf.mxu0 }
  0xe9   :  { %v219_v0 = vadd.f32 %v218_v36, %v66_v54  ;;  %v209_v36 = vadd.f32 %v208_v32, %v62_v5 }
  0xea   :  { %v222_v37 = vpop.f32.mrf.mxu0 }
  0xeb   :  { %v223_v6 = vadd.f32 %v222_v37, %v67_v57  ;;  %v248_v37 = vmax.f32 %v219_v0, 0.0 }
  0xec   :  { %v224_v38 = vpop.f32.mrf.mxu0 }
  0xed   :  { %v225_v58 = vadd.f32 %v224_v38, %v68_v47  ;;  %v249_v34 = vmax.f32 %v223_v6, 0.0  ;;  %v242_v47 = vmax.f32 %v205_v35, 0.0 }
  0xee   :  { %v226_v39 = vpop.f32.mrf.mxu0 }
  0xef   :  { %v227_v61 = vadd.f32 %v226_v39, %v69_v50  ;;  %v250_v10 = vmax.f32 %v225_v58, 0.0  ;;  %v213_v39 = vadd.f32 %v212_v33, %v63_v8 }
  0xf0   :  { %v228_v40 = vpop.f32.mrf.mxu0 }
  0xf1   :  { %v229_v51 = vadd.f32 %v228_v40, %v70_v42  ;;  %v251_v14 = vmax.f32 %v227_v61, 0.0  ;;  %v59_v40 = vld [vmem:[%s1068_s2] sm:$0xff]  ;;  %v207_v42 = vadd.f32 %v971_v31, %v61_v16  ;;  %v245_v33 = vmax.f32 %v213_v39, 0.0 }
  0xf2   :  { %v232_v41 = vpop.f32.mrf.mxu0 }
  0xf3   :  { %v233_v55 = vadd.f32 %v232_v41, %v71_v46  ;;  %v252_v1 = vmax.f32 %v229_v51, 0.0  ;;  %v246_v41 = vmax.f32 %v215_v9, 0.0  ;;  %v261_v32 = vpack.c.bf16 %v251_v14, %v249_v34 }
  0xf4   :  { %v234_v44 = vpop.f32.mrf.mxu0  ;;  %v203_v46 = vadd.f32 %v969_v29, %v59_v40  ;;  %v806_v29 = vmov 1   ;;  %v807_v51 = vmov 2  }
  0xf5   :  { %v235_v52 = vadd.f32 %v234_v44, %v72_v43  ;;  %v253_v7 = vmax.f32 %v233_v55, 0.0  ;;  %v262_v38 = vpack.c.bf16 %v252_v1, %v250_v10  ;;  %v247_v43 = vmax.f32 %v217_v13, 0.0  ;;  %746 = vset.pattern.permute.xlu1 %v806_v29  ;;  %748 = vset.pattern.permute.xlu0 %v807_v51 }
  0xf6   :  { %v236_v48 = vpop.f32.mrf.mxu0  ;;  %v244_v44 = vmax.f32 %v209_v36, 0.0  ;;  %v241_v50 = vmax.f32 %v203_v46, 0.0  ;;  %440 = vperm.xlu1 %746, %v936_v23   ;;  %581 = vperm.xlu0 %748, %v936_v23   ;;  %v46_v23 = vld [vmem:[%s1070_s4] sm:$0x1] }
  0xf7   :  { %v237_v53 = vadd.f32 %v236_v48, %v73_v45  ;;  %v254_v3 = vmax.f32 %v235_v52, 0.0  ;;  %v260_v45 = vpack.c.bf16 %v248_v37, %v246_v41  ;;  %v243_v48 = vmax.f32 %v207_v42, 0.0 }
  0xf8   :  { %v238_v56 = vpop.f32.mrf.mxu0  ;;  %v258_v30 = vpack.c.bf16 %v244_v44, %v242_v47 }
  0xf9   :  { %v239_v59 = vadd.f32 %v238_v56, %v74_v49  ;;  %v255_v62 = vmax.f32 %v237_v53, 0.0  ;;  %v259_v49 = vpack.c.bf16 %v247_v43, %v245_v33  ;;  %v257_v31 = vpack.c.bf16 %v243_v48, %v241_v50 }
  0xfa   :  { %444 = vperm.xlu1 %746, %v929_v22   ;;  %749 = vset.pattern.permute.xlu0 %v806_v29 }
  0xfb   :  { %v256_v4 = vmax.f32 %v239_v59, 0.0  ;;  %v263_v15 = vpack.c.bf16 %v255_v62, %v253_v7  ;;  %436 = vperm.xlu0 %749, %v941_v24  }
  0xfd   :  { %v264_v11 = vpack.c.bf16 %v256_v4, %v254_v3 }
  0xfe   :  { %747 = vset.pattern.permute.xlu1 %v807_v51 }
  0xff   :  { %346 = vmatprep.subr.bf16.mxu0 %v264_v11  ;;  %729 = vmatprep.subr.bf16.mxu1 %v264_v11 }
 0x100   :  { %347 = vmatpush1.bf16.msra.mxu0 %v263_v15  ;;  %733 = vmatpush1.bf16.msra.mxu1 %v263_v15 }
 0x101   :  { %348 = vmatprep.subr.bf16.mxu0 %v262_v38  ;;  %730 = vmatprep.subr.bf16.mxu1 %v262_v38 }
 0x102   :  { %577 = vperm.xlu1 %747, %v941_v24   ;;  %448 = vperm.xlu0 %749, %v924_v21   ;;  %v808_v24 = vmov 3  }
 0x104   :  { %349 = vmatpush1.bf16.msra.mxu0 %v261_v32  ;;  %734 = vmatpush1.bf16.msra.mxu1 %v261_v32 }
 0x105   :  { %350 = vmatprep.subr.bf16.mxu0 %v260_v45  ;;  %731 = vmatprep.subr.bf16.mxu1 %v260_v45 }
 0x106   :  { %750 = vset.pattern.permute.xlu1 %v806_v29  ;;  %456 = vperm.xlu0 %749, %v917_v20  }
 0x107   :  { %452 = vperm.xlu1 %750, %v905_v18  }
 0x108   :  { %351 = vmatpush1.bf16.msra.mxu0 %v259_v49  ;;  %735 = vmatpush1.bf16.msra.mxu1 %v259_v49 }
 0x109   :  { %352 = vmatprep.subr.bf16.mxu0 %v258_v30  ;;  %732 = vmatprep.subr.bf16.mxu1 %v258_v30 }
 0x10a   :  { %753 = vset.pattern.permute.xlu0 %v807_v51 }
 0x10b   :  { %751 = vset.pattern.permute.xlu1 %v807_v51  ;;  %593 = vperm.xlu0 %753, %v905_v18   ;;  %v298_v18 = vpop.permute.xlu0 %297 }
 0x10c   :  { %353 = vmatpush1.bf16.msra.mxu0 %v257_v31  ;;  %736 = vmatpush1.bf16.msra.mxu1 %v257_v31 }
 0x10d   :  { %585 = vperm.xlu1 %751, %v929_v22   ;;  %v288_v22 = vpop.permute.xlu1 %287 }
 0x10f   :  { %723 = vmatmul.mubr.msk.bf16.vlgmr.msra.gmra.mxu1 %vm325_vm1, %v960_v27  ;;  %721 = vmatmul.mubr.msk.bf16.vlgmr.msra.gmra.mxu0 %vm325_vm1, %v948_v25  ;;  %v303_v53 = vpop.permute.xlu0 %302 }
 0x110   :  { %400 = vmatprep.mubr.bf16.mxu1 %v804_v2  ;;  %380 = vmatprep.mubr.bf16.mxu0 %v804_v2 }
 0x111   :  { %601 = vperm.xlu0 %753, %v900_v17   ;;  %589 = vperm.xlu1 %751, %v924_v21   ;;  %v293_v54 = vpop.permute.xlu1 %292 }
 0x115   :  { %755 = vset.pattern.permute.xlu0 %v808_v24  ;;  %752 = vset.pattern.permute.xlu1 %v806_v29  ;;  %v283_v60 = vpop.permute.xlu1 %282 }
 0x116   :  { %652 = vperm.xlu0 %755, %v46_v23   ;;  %460 = vperm.xlu1 %752, %v900_v17  }
 0x117   :  { %724 = vmatmul.mubr.msk.bf16.gmra.mxu1 %vm325_vm1, %v965_v28  ;;  %722 = vmatmul.mubr.msk.bf16.gmra.mxu0 %vm325_vm1, %v953_v26 }
 0x118   :  { %519 = vmatprep.mubr.bf16.mxu1 %v804_v2 }
 0x119   :  { %v273_v15 = vpop.permute.xlu1 %272 }
 0x11a   :  { %464 = vperm.xlu1 %752, %v912_v19  }
 0x11e   :  { %754 = vset.pattern.permute.xlu1 %v807_v51 }
 0x11f   :  { %597 = vperm.xlu1 %754, %v917_v20   ;;  %v278_v20 = vpop.permute.xlu0 %277 }
 0x123   :  { %605 = vperm.xlu1 %754, %v912_v19   ;;  %v268_v16 = vpop.permute.xlu0 %267 }
 0x1cf   :  { %v392_v21 = vpop.f32.mrf.mxu1  ;;  %v372_v25 = vpop.f32.mrf.mxu0 }
 0x1d0   :  { %v393_v13 = vadd.f32 %v392_v21, %v288_v22  ;;  %v373_v47 = vadd.f32 %v372_v25, %v268_v16  ;;  %v470_v21 = vpop.permute.xlu1 %469 }
 0x1d1   :  { %v394_v26 = vpop.f32.mrf.mxu1  ;;  %v374_v27 = vpop.f32.mrf.mxu0 }
 0x1d2   :  { %v395_v5 = vadd.f32 %v394_v26, %v288_v22  ;;  %v375_v41 = vadd.f32 %v374_v27, %v268_v16  ;;  %v419_v32 = vmax.f32 %v393_v13, 0.0  ;;  %v411_v51 = vmax.f32 %v373_v47, 0.0  ;;  %v468_v22 = vpop.permute.xlu0 %467 }
 0x1d3   :  { %v396_v28 = vpop.f32.mrf.mxu1  ;;  %v376_v52 = vpop.f32.mrf.mxu0 }
 0x1d4   :  { %v397_v7 = vadd.f32 %v396_v28, %v293_v54  ;;  %v420_v36 = vmax.f32 %v395_v5, 0.0  ;;  %v377_v33 = vadd.f32 %v376_v52, %v273_v15  ;;  %v412_v30 = vmax.f32 %v375_v41, 0.0  ;;  %v474_v26 = vpop.permute.xlu1 %473 }
 0x1d5   :  { %v398_v55 = vpop.f32.mrf.mxu1  ;;  %v378_v56 = vpop.f32.mrf.mxu0 }
 0x1d6   :  { %v399_v62 = vadd.f32 %v398_v55, %v293_v54  ;;  %v421_v39 = vmax.f32 %v397_v7, 0.0  ;;  %v379_v35 = vadd.f32 %v378_v56, %v273_v15  ;;  %v413_v29 = vmax.f32 %v377_v33, 0.0  ;;  %v472_v25 = vpop.permute.xlu0 %471 }
 0x1d7   :  { %v402_v17 = vpop.f32.mrf.mxu1  ;;  %v382_v57 = vpop.f32.mrf.mxu0 }
 0x1d8   :  { %v403_v1 = vadd.f32 %v402_v17, %v298_v18  ;;  %v422_v9 = vmax.f32 %v399_v62, 0.0  ;;  %v383_v44 = vadd.f32 %v382_v57, %v278_v20  ;;  %v431_v46 = vpack.c.bf16 %v421_v39, %v419_v32  ;;  %v441_v27 = vpop.permute.xlu1 %440 }
 0x1d9   :  { %v404_v58 = vpop.f32.mrf.mxu1  ;;  %v384_v59 = vpop.f32.mrf.mxu0  ;;  %v414_v49 = vmax.f32 %v379_v35, 0.0 }
 0x1da   :  { %v405_v63 = vadd.f32 %v404_v58, %v298_v18  ;;  %v423_v14 = vmax.f32 %v403_v1, 0.0  ;;  %v385_v37 = vadd.f32 %v384_v59, %v278_v20  ;;  %v432_v43 = vpack.c.bf16 %v422_v9, %v420_v36  ;;  %v582_v54 = vpop.permute.xlu0 %581 }
 0x1db   :  { %v406_v61 = vpop.f32.mrf.mxu1  ;;  %v386_v19 = vpop.f32.mrf.mxu0  ;;  %v415_v31 = vmax.f32 %v383_v44, 0.0  ;;  %v428_v24 = vpack.c.bf16 %v414_v49, %v412_v30  ;;  %v427_v18 = vpack.c.bf16 %v413_v29, %v411_v51 }
 0x1dc   :  { %v407_v0 = vadd.f32 %v406_v61, %v303_v53  ;;  %v424_v10 = vmax.f32 %v405_v63, 0.0  ;;  %v387_v40 = vadd.f32 %v386_v19, %v283_v60  ;;  %v416_v45 = vmax.f32 %v385_v37, 0.0  ;;  %v445_v28 = vpop.permute.xlu1 %444 }
 0x1dd   :  { %v408_v3 = vpop.f32.mrf.mxu1  ;;  %v388_v4 = vpop.f32.mrf.mxu0 }
 0x1de   :  { %v409_v6 = vadd.f32 %v408_v3, %v303_v53  ;;  %v425_v8 = vmax.f32 %v407_v0, 0.0  ;;  %v389_v12 = vadd.f32 %v388_v4, %v283_v60  ;;  %v417_v48 = vmax.f32 %v387_v40, 0.0  ;;  %v437_v58 = vpop.permute.xlu0 %436 }
 0x1e0   :  { %v426_v11 = vmax.f32 %v409_v6, 0.0  ;;  %v433_v34 = vpack.c.bf16 %v425_v8, %v423_v14  ;;  %v418_v42 = vmax.f32 %v389_v12, 0.0  ;;  %v429_v23 = vpack.c.bf16 %v417_v48, %v415_v31  ;;  %v578_v52 = vpop.permute.xlu1 %577 }
 0x1e2   :  { %v434_v38 = vpack.c.bf16 %v426_v11, %v424_v10  ;;  %v430_v50 = vpack.c.bf16 %v418_v42, %v416_v45  ;;  %v449_v61 = vpop.permute.xlu0 %448 }
 0x1e4   :  { %495 = vmatprep.subr.bf16.mxu1 %v434_v38  ;;  %v453_v53 = vpop.permute.xlu1 %452 }
 0x1e5   :  { %496 = vmatpush1.bf16.msra.mxu1 %v433_v34 }
 0x1e6   :  { %497 = vmatprep.subr.bf16.mxu1 %v432_v43  ;;  %v457_v10 = vpop.permute.xlu0 %456 }
 0x1e8   :  { %v586_v56 = vpop.permute.xlu1 %585 }
 0x1e9   :  { %498 = vmatpush1.bf16.msra.mxu1 %v431_v46 }
 0x1ea   :  { %499 = vmatprep.subr.bf16.mxu1 %v430_v50  ;;  %v594_v46 = vpop.permute.xlu0 %593 }
 0x1ec   :  { %v590_v60 = vpop.permute.xlu1 %589 }
 0x1ed   :  { %500 = vmatpush1.bf16.msra.mxu1 %v429_v23 }
 0x1ee   :  { %501 = vmatprep.subr.bf16.mxu1 %v428_v24 }
 0x1f0   :  { %v461_v3 = vpop.permute.xlu1 %460 }
 0x1f1   :  { %502 = vmatpush1.bf16.msra.mxu1 %v427_v18 }
 0x1f4   :  { %725 = vmatmul.mubr.msk.bf16.vlgmr.msra.gmra.mxu1 %vm325_vm1, %v468_v22  ;;  %v465_v34 = vpop.permute.xlu1 %464 }
 0x1f5   :  { %529 = vmatprep.mubr.bf16.mxu1 %v804_v2 }
 0x1f8   :  { %v598_v22 = vpop.permute.xlu1 %597 }
 0x1fc   :  { %726 = vmatmul.mubr.msk.bf16.gmra.mxu1 %vm325_vm1, %v470_v21 }
 0x1fd   :  { %539 = vmatprep.mubr.bf16.mxu1 %v804_v2 }
 0x204   :  { %727 = vmatmul.mubr.msk.bf16.gmra.mxu1 %vm325_vm1, %v472_v25 }
 0x205   :  { %549 = vmatprep.mubr.bf16.mxu1 %v804_v2 }
 0x20c   :  { %728 = vmatmul.mubr.msk.bf16.gmra.mxu1 %vm325_vm1, %v474_v26 }
 0x2b4   :  { %v521_v55 = vpop.f32.mrf.mxu1 }
 0x2b5   :  { %v522_v2 = vadd.f32 %v521_v55, %v437_v58 }
 0x2b6   :  { %v523_v17 = vpop.f32.mrf.mxu1 }
 0x2b7   :  { %v524_v4 = vadd.f32 %v523_v17, %v437_v58  ;;  %v560_v9 = vmax.f32 %v522_v2, 0.0 }
 0x2b8   :  { %v525_v57 = vpop.f32.mrf.mxu1 }
 0x2b9   :  { %v526_v19 = vadd.f32 %v525_v57, %v441_v27  ;;  %v561_v15 = vmax.f32 %v524_v4, 0.0  ;;  %v608_v40 = vmul.f32 %v578_v52, %v560_v9 }
 0x2ba   :  { %v527_v59 = vpop.f32.mrf.mxu1 }
 0x2bb   :  { %v528_v63 = vadd.f32 %v527_v59, %v441_v27  ;;  %v562_v5 = vmax.f32 %v526_v19, 0.0  ;;  %v609_v45 = vmul.f32 %v578_v52, %v561_v15 }
 0x2bc   :  { %v531_v20 = vpop.f32.mrf.mxu1 }
 0x2bd   :  { %v532_v0 = vadd.f32 %v531_v20, %v445_v28  ;;  %v563_v11 = vmax.f32 %v528_v63, 0.0  ;;  %v610_v36 = vmul.f32 %v582_v54, %v562_v5  ;;  %v606_v5 = vpop.permute.xlu1 %605 }
 0x2be   :  { %v533_v62 = vpop.f32.mrf.mxu1 }
 0x2bf   :  { %v534_v6 = vadd.f32 %v533_v62, %v445_v28  ;;  %v564_v12 = vmax.f32 %v532_v0, 0.0  ;;  %v611_v41 = vmul.f32 %v582_v54, %v563_v11  ;;  %v624_v47 = vadd.f32 %v610_v36, %v608_v40  ;;  %v602_v54 = vpop.permute.xlu0 %601 }
 0x2c0   :  { %v535_v1 = vpop.f32.mrf.mxu1 }
 0x2c1   :  { %v536_v7 = vadd.f32 %v535_v1, %v449_v61  ;;  %v565_v37 = vmax.f32 %v534_v6, 0.0  ;;  %v612_v42 = vmul.f32 %v586_v56, %v564_v12  ;;  %v637_v51 = vadd.f32 %v611_v41, %v609_v45 }
 0x2c2   :  { %v537_v8 = vpop.f32.mrf.mxu1 }
 0x2c3   :  { %v538_v13 = vadd.f32 %v537_v8, %v449_v61  ;;  %v566_v38 = vmax.f32 %v536_v7, 0.0  ;;  %v613_v48 = vmul.f32 %v586_v56, %v565_v37  ;;  %v625_v23 = vadd.f32 %v624_v47, %v612_v42  ;;  %v653_v45 = vpop.permute.xlu0 %652 }
 0x2c4   :  { %v541_v14 = vpop.f32.mrf.mxu1  ;;  %v809_v37 = vmov 1966171168  }
 0x2c5   :  { %v542_v16 = vadd.f32 %v541_v14, %v453_v53  ;;  %v567_v43 = vmax.f32 %v538_v13, 0.0  ;;  %v614_v49 = vmul.f32 %v590_v60, %v566_v38  ;;  %v638_v27 = vadd.f32 %v637_v51, %v613_v48 }
 0x2c6   :  { %v543_v39 = vpop.f32.mrf.mxu1  ;;  %v663_v38 = vunpack.c.l.s4 %v809_v37 }
 0x2c7   :  { %v544_v35 = vadd.f32 %v543_v39, %v453_v53  ;;  %v568_v32 = vmax.f32 %v542_v16, 0.0  ;;  %v615_v24 = vmul.f32 %v590_v60, %v567_v43  ;;  %v626_v28 = vadd.f32 %v625_v23, %v614_v49 }
 0x2c8   :  { %v545_v44 = vpop.f32.mrf.mxu1  ;;  %v665_v39 = vlaneseq  ;;  %v664_v42 = vunpack.c.0.s8 %v663_v38 }
 0x2c9   :  { %v546_v33 = vadd.f32 %v545_v44, %v457_v10  ;;  %v569_v30 = vmax.f32 %v544_v35, 0.0  ;;  %v616_v18 = vmul.f32 %v594_v46, %v568_v32  ;;  %v639_v57 = vadd.f32 %v638_v27, %v615_v24 }
 0x2ca   :  { %v547_v50 = vpop.f32.mrf.mxu1  ;;  %v666_v43 = vshrl.u32 %v665_v39, 7  ;;  %vm680_vm3 = vcmp.lt.s32.totalorder %v665_v39, 256 }
 0x2cb   :  { %v570_v31 = vmax.f32 %v546_v33, 0.0  ;;  %v548_v29 = vadd.f32 %v547_v50, %v457_v10  ;;  %v617_v52 = vmul.f32 %v594_v46, %v569_v30  ;;  %v627_v58 = vadd.f32 %v626_v28, %v616_v18  ;;  %v657_v30 = vld [vmem:[%s1067_s1] sm:$0x3] }
 0x2cc   :  { %v551_v21 = vpop.f32.mrf.mxu1  ;;  %v667_v33 = vsub.s32 %v664_v42, %v666_v43  ;;  %vm658_vm2 = vcmp.gt.f32.partialorder %v657_v30, 0.0 }
 0x2cd   :  { %v571_v25 = vmax.f32 %v548_v29, 0.0  ;;  %v552_v26 = vadd.f32 %v551_v21, %v461_v3  ;;  %v618_v55 = vmul.f32 %v598_v22, %v570_v31  ;;  %v640_v62 = vadd.f32 %v639_v57, %v617_v52 }
 0x2ce   :  { %v553_v53 = vpop.f32.mrf.mxu1 }
 0x2cf   :  { %v572_v56 = vmax.f32 %v552_v26, 0.0  ;;  %v554_v17 = vadd.f32 %v553_v53, %v461_v3  ;;  %v619_v20 = vmul.f32 %v598_v22, %v571_v25  ;;  %v628_v63 = vadd.f32 %v627_v58, %v618_v55 }
 0x2d0   :  { %v555_v59 = vpop.f32.mrf.mxu1 }
 0x2d1   :  { %v573_v61 = vmax.f32 %v554_v17, 0.0  ;;  %v620_v19 = vmul.f32 %v602_v54, %v572_v56  ;;  %v556_v60 = vadd.f32 %v555_v59, %v465_v34  ;;  %v641_v6 = vadd.f32 %v640_v62, %v619_v20 }
 0x2d2   :  { %v557_v2 = vpop.f32.mrf.mxu1 }
 0x2d3   :  { %v621_v0 = vmul.f32 %v602_v54, %v573_v61  ;;  %v574_v1 = vmax.f32 %v556_v60, 0.0  ;;  %v558_v4 = vadd.f32 %v557_v2, %v465_v34  ;;  %v629_v7 = vadd.f32 %v628_v63, %v620_v19 }
 0x2d5   :  { %v575_v8 = vmax.f32 %v558_v4, 0.0  ;;  %v622_v9 = vmul.f32 %v606_v5, %v574_v1  ;;  %v642_v10 = vadd.f32 %v641_v6, %v621_v0 }
 0x2d7   :  { %v623_v3 = vmul.f32 %v606_v5, %v575_v8  ;;  %v630_v11 = vadd.f32 %v629_v7, %v622_v9 }
 0x2d9   :  { %v631_v12 = vrot.slane %v630_v11, 4  ;;  %v643_v13 = vadd.f32 %v642_v10, %v623_v3 }
 0x2db   :  { %v632_v14 = vadd.f32 %v631_v12, %v630_v11  ;;  %v644_v15 = vrot.slane %v643_v13, 4 }
 0x2dd   :  { %v645_v16 = vadd.f32 %v644_v15, %v643_v13  ;;  %v633_v36 = vrot.slane %v632_v14, 2 }
 0x2df   :  { %v634_v40 = vadd.f32 %v633_v36, %v632_v14  ;;  %v646_v35 = vrot.slane %v645_v16, 2 }
 0x2e1   :  { %v635_v34 = vrot.slane %v634_v40, 1  ;;  %v647_v41 = vadd.f32 %v646_v35, %v645_v16 }
 0x2e3   :  { %v636_v32 = vadd.f32 %v635_v34, %v634_v40  ;;  %v648_v44 = vrot.slane %v647_v41, 1 }
 0x2e5   :  { %v649_v46 = vadd.f32 %v648_v44, %v647_v41  ;;  %v655_v47 = vadd.f32 %v653_v45, %v636_v32 }
 0x2e7   :  { %v656_v48 = vadd.f32 %v653_v45, %v649_v46 }
 0x2e9   :  { %v661_v49 = vcombine.low %v655_v47, %v656_v48 }
 0x2eb   :  { %v668_v50 = vrot.slane %v661_v49, %v667_v33 }
 0x2ed   :  { %v675_v31 = vrot.slane %v668_v50, %v667_v33 }
 0x2ef   :  { %v677_v29 = vsel %vm658_vm2, %v675_v31, -1e+30 }
 0x2f0   :  { %682 = vst.msk [vmem:[#allocation2] sm:$0x3] %vm680_vm3, %v677_v29 }
 0x2f1   :  { %793 = shalt.err (!%p790_p4)
}
 0x2f2   :  { %692 = dma.vmem_to_hbm [thread:$0]  %s690_s30, 32, %s1071_s5, [#allocation3]  }
 0x2f3   :  { %802 = dma.done.wait [#allocation3], 32  }
 0x2f4   :  { %803 = vsyncadd [#allocation3], 4294967264 }
 0x2f5   :  { %696 = vsyncpa [#allocation3], 1 }

</bundles_post_ra>
